<compile_context>
chip_gen: v5e
topology: v5e:2x2
jax: 0.10.0
libtpu: 0.0.40
codegen_flags: <defaults>
</compile_context>

<pallas_src>
import math

import jax
import jax.numpy as jnp
from jax.experimental import pallas as pl
from jax.experimental.pallas import tpu as pltpu

batch_size = 1
hidden_size = 5
input_size = 5
num_classes = 5
num_layers = 1
sequence_length = 1


def _rnn_fused_cell_kernel(xh_ref, w_ref, b_ref, h1_ref):
    # Single fused matmul + bias + tanh. One MXU pass, one VPU add, one EUP tanh.
    xh = xh_ref[...]          # (1, input + hidden) = (1, 10)
    w = w_ref[...]            # (input + hidden, hidden) = (10, 5)  [pre-transposed, pre-stacked]
    b = b_ref[...]            # (1, hidden) = (1, 5)                [b_ih + b_hh pre-summed]
    h1_ref[...] = jnp.tanh(
        jnp.dot(xh, w, preferred_element_type=jnp.float32) + b
    ).astype(h1_ref.dtype)


def rnn_cell_fused(xh, w_packed, b_packed):
    # Tiny operands: single invocation, full-array blocks resident in VMEM.
    vmem = pl.BlockSpec(memory_space=pltpu.MemorySpace.VMEM)
    return pl.pallas_call(
        _rnn_fused_cell_kernel,
        out_shape=jax.ShapeDtypeStruct((batch_size, hidden_size), jnp.float32),
        in_specs=[vmem, vmem, vmem],
        out_specs=vmem,
    )(xh, w_packed, b_packed)


def model_forward(hidden, x, params):
    """Mirrors Model.forward(hidden, x).

    hidden: (num_layers, batch, hidden) = (1, 1, 5)
    x:      any shape with batch*seq*input = 5 elements (PyTorch .view)
    params: (w_packed (10,5), b_packed (1,5))
    returns (hidden', out.view(-1, num_classes)) = ((1,1,5), (1,5))
    """
    w_packed, b_packed = params
    x2d = jnp.reshape(x, (batch_size * sequence_length, input_size)).astype(jnp.float32)
    h0_2d = jnp.reshape(hidden, (batch_size, hidden_size)).astype(jnp.float32)

    # Concatenate [x | h0] once outside the kernel (tiny, one XLA op).
    xh = jnp.concatenate([x2d, h0_2d], axis=1)            # (1, 10)

    h1 = rnn_cell_fused(xh, w_packed, b_packed)           # (1, 5)

    # seq_len == 1: out == h1; hidden == h1 (single layer)
    new_hidden = jnp.reshape(h1, (num_layers, batch_size, hidden_size))
    out_flat = jnp.reshape(h1, (-1, num_classes))
    return new_hidden, out_flat


def init_params(key):
    # PyTorch nn.RNN init: U(-1/sqrt(hidden), 1/sqrt(hidden)) for all params,
    # then pack once (pre-transpose + stack weights, pre-sum biases).
    bound = 1.0 / math.sqrt(hidden_size)
    k1, k2, k3, k4 = jax.random.split(key, 4)
    w_ih = jax.random.uniform(k1, (hidden_size, input_size), jnp.float32, -bound, bound)
    w_hh = jax.random.uniform(k2, (hidden_size, hidden_size), jnp.float32, -bound, bound)
    b_ih = jax.random.uniform(k3, (1, hidden_size), jnp.float32, -bound, bound)
    b_hh = jax.random.uniform(k4, (1, hidden_size), jnp.float32, -bound, bound)

    # [x | h0] @ [W_ih.T ; W_hh.T] == x @ W_ih.T + h0 @ W_hh.T
    w_packed = jnp.concatenate([w_ih.T, w_hh.T], axis=0)  # (input + hidden, hidden) = (10, 5)
    b_packed = b_ih + b_hh                                # (1, hidden) = (1, 5)
    return w_packed, b_packed


if __name__ == "__main__":
    key = jax.random.PRNGKey(0)
    kp, kx = jax.random.split(key)
    params = init_params(kp)

    x = jax.random.normal(kx, (batch_size, sequence_length, input_size), jnp.float32)
    hidden0 = jnp.zeros((num_layers, batch_size, hidden_size), jnp.float32)  # init_hidden()

    new_hidden, out = model_forward(hidden0, x, params)
    jax.block_until_ready((new_hidden, out))

    assert new_hidden.shape == (num_layers, batch_size, hidden_size)
    assert out.shape == (batch_size * sequence_length, num_classes)
    print("KERNEL_OK")
</pallas_src>

<mosaic_0001>
module attributes {stable_mosaic.version = 11 : i64} {
  func.func @_rnn_fused_cell_kernel(%arg0: memref<1x10xf32, #tpu.memory_space<vmem>>, %arg1: memref<10x5xf32, #tpu.memory_space<vmem>>, %arg2: memref<1x5xf32, #tpu.memory_space<vmem>>, %arg3: memref<1x5xf32, #tpu.memory_space<vmem>>) attributes {dimension_semantics = [], scalar_prefetch = 0 : i64, scratch_operands = 0 : i64, tpu.core_type = #tpu.core_type<tc>} {
    %c0 = arith.constant 0 : index
    %c0_0 = arith.constant 0 : index
    %0 = vector.load %arg0[%c0, %c0_0] : memref<1x10xf32, #tpu.memory_space<vmem>>, vector<1x10xf32>
    %c0_1 = arith.constant 0 : index
    %c0_2 = arith.constant 0 : index
    %1 = vector.load %arg1[%c0_1, %c0_2] : memref<10x5xf32, #tpu.memory_space<vmem>>, vector<10x5xf32>
    %c0_3 = arith.constant 0 : index
    %c0_4 = arith.constant 0 : index
    %2 = vector.load %arg2[%c0_3, %c0_4] : memref<1x5xf32, #tpu.memory_space<vmem>>, vector<1x5xf32>
    %cst = arith.constant dense<0.000000e+00> : vector<1x5xf32>
    %3 = tpu.matmul %0, %1, %cst {dimension_numbers = #tpu.dot_dimension_numbers<[1], [0], [0], [1], [0, 0, 1, 1], [], []>} : vector<1x10xf32>, vector<10x5xf32>, vector<1x5xf32> -> vector<1x5xf32>
    %4 = arith.addf %3, %2 : vector<1x5xf32>
    %5 = math.tanh %4 : vector<1x5xf32>
    %c0_5 = arith.constant 0 : index
    %c0_6 = arith.constant 0 : index
    %6 = vector.load %arg3[%c0_5, %c0_6] : memref<1x5xf32, #tpu.memory_space<vmem>>, vector<1x5xf32>
    tpu.vector_store %arg3[%c0_5, %c0_6], %5 {strides = array<i32>} : memref<1x5xf32, #tpu.memory_space<vmem>>, vector<1x5xf32>,
    return
  }
}

</mosaic_0001>

<bundles_post_ra>
// kernel: tpu_custom_call.1
= control target key start
LH: loop header
LB: loop body
LE: loop exit
PB: predicated region body
PF: predicated region fallthrough
CT: control target
= control target key end

     0   :  { %vm23_vm0 = vcmask 1041408   ;;  %vm19_vm1 = vcmask 80896   ;;  %s133_s0 = inlined_call_operand.vmem [shape: f32[1,10], index: 0, kind: input, shape index: {}]   ;;  %s134_s1 = inlined_call_operand.vmem [shape: f32[10,5], index: 1, kind: input, shape index: {}]   ;;  %s135_s2 = inlined_call_operand.vmem [shape: f32[1,5], index: 2, kind: input, shape index: {}]   ;;  %s136_s3 = inlined_call_operand.hbm [shape: f32[1,5], index: 3, kind: output, shape index: {}]  }
   0x1   :  { %v17_v0 = vld [vmem:[%s134_s1 + $0x8] sm:$0x3]  ;;  %v16_v1 = vld [vmem:[%s134_s1] sm:$0xff] }
   0x2   :  { %66 = vmatpush.msk.msra.mxu0 %vm23_vm0, %v17_v0  ;;  %v15_v2 = vld [vmem:[%s133_s0] sm:$0x1] }
   0x3   :  { %8 = vsyncpa [#allocation3], 0  ;;  %v18_v3 = vld [vmem:[%s135_s2] sm:$0x1]  ;;  %s97_s20 = smov [#allocation2]   ;;  %s57_s23 = sshll.u32 %s136_s3, 4  ;;  %s58_s23 = int_to_ptr.hbm [resolvable:$true] %s57_s23 }
   0x4   :  { %42 = vmatpush.msra.mxu0 %v16_v1  ;;  %s55_s21 = sshll.u32 %s97_s20, 4  ;;  %vm48_vm2 = vcmask 32768   ;;  %s56_s21 = int_to_ptr.vmem [resolvable:$true] %s55_s21 }
   0x5   :  { %67 = vmatmul.msk.f32.vlgmr.msra.gmra.mxu0 %vm19_vm1, %v15_v2 }
  0x82   :  { %v44_v4 = vpop.f32.mrf.mxu0 }
  0x83   :  { %v45_v5 = vadd.f32 %v44_v4, %v18_v3 }
  0x85   :  { %69 = vtanh.f32 %v45_v5 }
  0x8b   :  { %v70_v6 = vpop.eup %69 }
  0x8c   :  { %49 = vst.msk [vmem:[#allocation2] sm:$0x1] %vm48_vm2, %v70_v6 }
  0x8d   :  { %60 = dma.vmem_to_hbm [thread:$0]  %s56_s21, 16, %s58_s23, [#allocation3]  }
  0x8e   :  { %95 = dma.done.wait [#allocation3], 16  }
  0x8f   :  { %96 = vsyncadd [#allocation3], 4294967280 }
  0x90   :  { %65 = vsyncpa [#allocation3], 1 }

</bundles_post_ra>
